<compile_context>
chip_gen: v7x
topology: tpu7x:2x2x1
jax: 0.10.0
libtpu: 0.0.40
codegen_flags: <defaults>
</compile_context>

<pallas_src>
import functools
import math

import jax
import jax.numpy as jnp
from jax.experimental import pallas as pl
from jax.experimental.pallas import tpu as pltpu

D_MODEL = 96

# Below this many bytes of activation, a standalone kernel launch is pure
# overhead; plain XLA `x + pe` (which fuses into neighbours) is strictly better.
_MIN_PALLAS_BYTES = 1 << 20


def make_pos_encoding(length: int) -> jnp.ndarray:
    """Deterministic parameter init, exactly mirroring the torch __init__."""
    i = jnp.arange(D_MODEL, dtype=jnp.float32)
    even = (jnp.arange(D_MODEL) % 2) == 0
    freqs = jnp.where(
        even,
        10000.0 ** (-i / D_MODEL),
        -(10000.0 ** ((1.0 - i) / D_MODEL)),
    )[:, None]                                             # (d_model, 1)
    phases = jnp.where(even, 0.0, math.pi / 2.0)[:, None]  # (d_model, 1)
    pos = jnp.broadcast_to(
        jnp.arange(length, dtype=jnp.float32)[None, :], (D_MODEL, length)
    )                                                      # (d_model, length)
    return jnp.sin(pos * freqs + phases)                   # (d_model, length)


def _pos_add_kernel(x_ref, pe_ref, o_ref):
    # x_ref: (TB, DLp) lane-dense block; pe_ref: (1, DLp) resident row.
    # Sublane-broadcast add; 2 vld + 1 vadd + 1 unmasked vst per vreg --
    # HBM-bandwidth bound, no instruction-level work worth doing here.
    o_ref[...] = x_ref[...] + pe_ref[...]


def _vmem_budget():
    """(vmem_limit_bytes, target_tile_bytes) for the current TPU generation."""
    try:
        cap = int(pltpu.get_tpu_info().vmem_capacity_bytes)
    except Exception:
        cap = 64 * 1024 * 1024  # be conservative (v7x-class) if query fails
    if cap <= 64 * 1024 * 1024:           # v7x: 64 MiB VMEM per TensorCore
        limit = 48 * 1024 * 1024
    else:                                  # v5e / v6e: 128 MiB VMEM
        limit = 100 * 1024 * 1024
    # Aliased in+out, each double-buffered => ~4x tile resident; leave headroom.
    target_tile = (limit - (4 << 20)) // 4
    return limit, target_tile


def _choose_row_block(batch: int, row_bytes: int, target_bytes: int) -> int:
    """Batch rows per grid step: big DMAs, even split for 2-TC balance."""
    total = batch * row_bytes
    if total <= target_bytes:
        return batch                       # single block (== full dim -> legal)
    n_blocks = -(-total // target_bytes)   # ceil
    if n_blocks % 2:
        n_blocks += 1                      # balanced across v7x's 2 TensorCores
    tb = -(-batch // n_blocks)             # ceil rows per block
    if batch >= 8:
        tb = max(8, ((tb + 7) // 8) * 8)   # keep (8,128) sublane tiling clean
    return max(1, min(tb, batch))


def pos_encoder(x: jnp.ndarray, pos_encoding: jnp.ndarray,
                *, force_pallas: bool = False) -> jnp.ndarray:
    """x: (B, d_model, length); returns x + pos_encoding (broadcast over B).

    Donation contract: the (flattened, possibly padded) view of `x` is aliased
    to the kernel output; do not rely on reusing that buffer after the call.
    """
    B, D, L = x.shape
    assert (D, L) == pos_encoding.shape
    dtype = x.dtype
    itemsize = jnp.dtype(dtype).itemsize
    DL = D * L

    if not force_pallas and B * DL * itemsize < _MIN_PALLAS_BYTES:
        # Toy shapes: let XLA fuse the add into neighbouring ops.
        return x + pos_encoding.astype(dtype)[None, :, :]

    # Lane-dense flatten; pad the lane dim to a multiple of 128 if needed.
    DL_pad = ((DL + 127) // 128) * 128
    x2 = x.reshape(B, DL)
    pe2 = pos_encoding.astype(dtype).reshape(1, DL)
    if DL_pad != DL:
        x2 = jnp.pad(x2, ((0, 0), (0, DL_pad - DL)))
        pe2 = jnp.pad(pe2, ((0, 0), (0, DL_pad - DL)))

    vmem_limit, target_tile = _vmem_budget()
    tb = _choose_row_block(B, DL_pad * itemsize, target_tile)
    grid = (pl.cdiv(B, tb),)

    out2 = pl.pallas_call(
        _pos_add_kernel,
        out_shape=jax.ShapeDtypeStruct((B, DL_pad), dtype),
        grid_spec=pltpu.PrefetchScalarGridSpec(
            num_scalar_prefetch=0,
            grid=grid,
            in_specs=[
                pl.BlockSpec((tb, DL_pad), lambda i: (i, 0)),
                pl.BlockSpec((1, DL_pad), lambda i: (0, 0)),
            ],
            out_specs=pl.BlockSpec((tb, DL_pad), lambda i: (i, 0)),
        ),
        compiler_params=pltpu.CompilerParams(
            dimension_semantics=("parallel",),
            vmem_limit_bytes=vmem_limit,
        ),
        cost_estimate=pl.CostEstimate(
            flops=B * DL,
            transcendentals=0,
            bytes_accessed=itemsize * (2 * B * DL_pad + DL_pad),
        ),
        # Pure elementwise x += pe: reuse x2's HBM buffer for the output.
        input_output_aliases={0: 0},
    )(x2, pe2)

    if DL_pad != DL:
        out2 = out2[:, :DL]
    return out2.reshape(B, D, L)


if __name__ == "__main__":
    key = jax.random.PRNGKey(0)
    k1, k2 = jax.random.split(key)

    # Kernel path (forced, since the toy size would otherwise take the XLA
    # fallback): lane-aligned length, 96*16 = 1536 = 12*128 lanes.
    batch, length = 2, 16
    x = jax.random.normal(k1, (batch, D_MODEL, length), dtype=jnp.float32)
    pe = make_pos_encoding(length)
    ref = x + pe[None, :, :]

    fn = jax.jit(functools.partial(pos_encoder, force_pallas=True))
    out = jax.block_until_ready(fn(x, pe))
    assert out.shape == (batch, D_MODEL, length)
    assert jnp.allclose(out, ref, atol=1e-6), "mismatch vs reference (aligned)"

    # Kernel path with lane padding: 96*10 = 960 is not a multiple of 128.
    length2 = 10
    x_b = jax.random.normal(k2, (batch, D_MODEL, length2), dtype=jnp.float32)
    pe_b = make_pos_encoding(length2)
    ref_b = x_b + pe_b[None, :, :]
    out_b = jax.block_until_ready(fn(x_b, pe_b))
    assert out_b.shape == (batch, D_MODEL, length2)
    assert jnp.allclose(out_b, ref_b, atol=1e-6), "mismatch vs reference (padded)"

    # Small-shape fallback path (no Pallas launch; XLA fuses the add).
    out_c = jax.block_until_ready(jax.jit(pos_encoder)(x, pe))
    assert jnp.allclose(out_c, ref, atol=1e-6), "mismatch vs reference (fallback)"

    print("KERNEL_OK")
</pallas_src>

<mosaic_0001>
module attributes {stable_mosaic.version = 11 : i64} {
  func.func @_pos_add_kernel(%arg0: i32, %arg1: memref<2x1536xf32, #tpu.memory_space<vmem>>, %arg2: memref<1x1536xf32, #tpu.memory_space<vmem>>, %arg3: memref<2x1536xf32, #tpu.memory_space<vmem>>) attributes {dimension_semantics = [#tpu.dimension_semantics<parallel>], iteration_bounds = array<i64: 1>, scalar_prefetch = 0 : i64, scratch_operands = 0 : i64, tpu.core_type = #tpu.core_type<tc>, window_params = [{transform_indices = @transform_0, window_bounds = array<i64: 2, 1536>}, {pipeline_mode = #tpu.pipeline_mode<synchronous>, transform_indices = @transform_1, window_bounds = array<i64: 1, 1536>}, {transform_indices = @transform_2, window_bounds = array<i64: 2, 1536>}]} {
    %c0 = arith.constant 0 : index
    %c0_0 = arith.constant 0 : index
    %0 = vector.load %arg1[%c0, %c0_0] : memref<2x1536xf32, #tpu.memory_space<vmem>>, vector<2x1536xf32>
    %c0_1 = arith.constant 0 : index
    %c0_2 = arith.constant 0 : index
    %1 = vector.load %arg2[%c0_1, %c0_2] : memref<1x1536xf32, #tpu.memory_space<vmem>>, vector<1x1536xf32>
    %2 = vector.broadcast %1 : vector<1x1536xf32> to vector<2x1536xf32>
    %3 = arith.addf %0, %2 : vector<2x1536xf32>
    %c0_3 = arith.constant 0 : index
    %c0_4 = arith.constant 0 : index
    %4 = vector.load %arg3[%c0_3, %c0_4] : memref<2x1536xf32, #tpu.memory_space<vmem>>, vector<2x1536xf32>
    tpu.vector_store %arg3[%c0_3, %c0_4], %3 {strides = array<i32>} : memref<2x1536xf32, #tpu.memory_space<vmem>>, vector<2x1536xf32>,
    return
  }
  func.func @transform_0(%arg0: i32) -> (i32, i32) {
    %c0_i32 = arith.constant 0 : i32
    %c0_i32_0 = arith.constant 0 : i32
    return %arg0, %c0_i32 : i32, i32
  }
  func.func @transform_1(%arg0: i32) -> (i32, i32) {
    %c0_i32 = arith.constant 0 : i32
    %c0_i32_0 = arith.constant 0 : i32
    %c0_i32_1 = arith.constant 0 : i32
    return %c0_i32, %c0_i32_0 : i32, i32
  }
  func.func @transform_2(%arg0: i32) -> (i32, i32) {
    %c0_i32 = arith.constant 0 : i32
    %c0_i32_0 = arith.constant 0 : i32
    return %arg0, %c0_i32 : i32, i32
  }
}

</mosaic_0001>

<bundles_post_ra>
// kernel: pos_encoder.1
= control target key start
LH: loop header
LB: loop body
LE: loop exit
PB: predicated region body
PF: predicated region fallthrough
CT: control target
= control target key end

     0   :  { %v18_v0 = vlaneseq  ;;  %v131_v1 = vmov 1983009808   ;;  %s171_s1 = inlined_call_operand.vmem [shape: f32[1,1536], index: 1, kind: input, shape index: {}]   ;;  %s172_s0 = inlined_call_operand.vmem [shape: f32[2,1536], index: 0, kind: input, shape index: {}, may-alias: {0,2}]   ;;  %s173_s2 = inlined_call_operand.vmem [shape: f32[2,1536], index: 2, kind: output, shape index: {}, may-alias: {0,2}]  }
   0x1   :  { %v69_v2 = vunpack.c.l.s4 %v131_v1  ;;  %v14_v4 = vld [vmem:[%s171_s1] sm:$0xff]  ;;  %v15_v14 = vld [vmem:[%s171_s1 + $0x8] sm:$0xf]  ;;  %v13_v44 = vld [vmem:[%s172_s0 + $0x10] sm:$0xff] }
   0x2   :  { %v19_v3 = vshrl.u32 %v18_v0, 7  ;;  %v11_v34 = vld [vmem:[%s172_s0] sm:$0xff]  ;;  %v12_v43 = vld [vmem:[%s172_s0 + $0x8] sm:$0xff] }
   0x3   :  { %v70_v5 = vunpack.c.0.s8 %v69_v2 }
   0x4   :  { %v20_v6 = vsub.s32 0, %v19_v3  ;;  %v24_v7 = vsub.s32 1, %v19_v3  ;;  %v28_v8 = vsub.s32 2, %v19_v3  ;;  %v32_v9 = vsub.s32 3, %v19_v3 }
   0x5   :  { %v73_v10 = vsub.s32 %v70_v5, %v19_v3  ;;  %v36_v11 = vsub.s32 4, %v19_v3  ;;  %v40_v12 = vsub.s32 5, %v19_v3  ;;  %v44_v13 = vsub.s32 6, %v19_v3 }
   0x6   :  { %v21_v15 = vrot.slane %v14_v4, %v20_v6  ;;  %v25_v16 = vrot.slane %v14_v4, %v24_v7  ;;  %v29_v17 = vrot.slane %v14_v4, %v28_v8  ;;  %v33_v18 = vrot.slane %v14_v4, %v32_v9 }
   0x7   :  { %v37_v19 = vrot.slane %v14_v4, %v36_v11  ;;  %v41_v20 = vrot.slane %v14_v4, %v40_v12  ;;  %v45_v21 = vrot.slane %v14_v4, %v44_v13  ;;  %v48_v22 = vsub.s32 7, %v19_v3 }
   0x8   :  { %v66_v23 = vcombine.low %v21_v15, %v25_v16  ;;  %v67_v24 = vcombine.low %v29_v17, %v33_v18  ;;  %v53_v25 = vrot.slane %v15_v14, %v20_v6  ;;  %v57_v26 = vrot.slane %v15_v14, %v24_v7 }
   0x9   :  { %v49_v27 = vrot.slane %v14_v4, %v48_v22  ;;  %v83_v28 = vcombine.low %v37_v19, %v41_v20  ;;  %v61_v29 = vrot.slane %v15_v14, %v28_v8  ;;  %v65_v30 = vrot.slane %v15_v14, %v32_v9 }
   0xa   :  { %v74_v31 = vrot.slane %v66_v23, %v73_v10  ;;  %v81_v32 = vrot.slane %v67_v24, %v73_v10  ;;  %v100_v33 = vcombine.low %v53_v25, %v57_v26 }
   0xb   :  { %v84_v35 = vcombine.low %v45_v21, %v49_v27  ;;  %v91_v36 = vrot.slane %v83_v28, %v73_v10  ;;  %v101_v37 = vcombine.low %v61_v29, %v65_v30 }
   0xc   :  { %v82_v38 = vcombine.low %v74_v31, %v81_v32  ;;  %v108_v39 = vrot.slane %v100_v33, %v73_v10 }
   0xd   :  { %v98_v40 = vrot.slane %v84_v35, %v73_v10  ;;  %v115_v41 = vrot.slane %v101_v37, %v73_v10 }
   0xe   :  { %v120_v42 = vadd.f32 %v82_v38, %v11_v34 }
   0xf   :  { %v99_v45 = vcombine.low %v91_v36, %v98_v40  ;;  %v116_v46 = vcombine.low %v108_v39, %v115_v41 }
  0x10   :  { %123 = vst [vmem:[%s173_s2] sm:$0xff] %v120_v42 }
  0x11   :  { %v121_v47 = vadd.f32 %v99_v45, %v12_v43  ;;  %v122_v48 = vadd.f32 %v116_v46, %v13_v44 }
  0x13   :  { %124 = vst [vmem:[%s173_s2 + $0x8] sm:$0xff] %v121_v47  ;;  %125 = vst [vmem:[%s173_s2 + $0x10] sm:$0xff] %v122_v48 }

</bundles_post_ra>
